<compile_context>
chip_gen: v7x
topology: tpu7x:2x2x1
jax: 0.10.0
libtpu: 0.0.40
codegen_flags: <defaults>
</compile_context>

<pallas_src>
import jax
import jax.numpy as jnp
from jax.experimental import pallas as pl
from jax.experimental.pallas import tpu as pltpu


def _regl2_kernel(pred_ref, targ_ref, out_ref):
    """One grid step: emit lane-dense vector partials for its row tile.

    out_ref block layout: (1, 3, 8, 128) f32
      [0] fore squared-error sum   [1] total squared-error sum   [2] fg count
    """
    p = pred_ref[...].astype(jnp.float32)
    t = targ_ref[...].astype(jnp.float32)

    diff = p - t
    sq = diff * diff
    fg = (t > 0).astype(jnp.float32)

    tm = p.shape[0]
    r = tm // 8
    # (tm,128) -> (tm//8, 8, 128): last two dims match the (8,128) vreg tile, so
    # this is layout-free; the axis-0 sum is pure VPU vreg+vreg adds (no XLU).
    out_ref[0, 0, :, :] = (sq * fg).reshape(r, 8, 128).sum(axis=0)
    out_ref[0, 1, :, :] = sq.reshape(r, 8, 128).sum(axis=0)
    out_ref[0, 2, :, :] = fg.reshape(r, 8, 128).sum(axis=0)


def reg_l2_loss(pred, target, *, tm=1024):
    """Computes RegL2Loss(pred, target) for arbitrary input shapes/dtypes."""
    assert pred.shape == target.shape
    n = pred.size
    lanes = 128

    # Tile-size selection: multiple of 8 rows, capped at the (padded) row count
    # and at 2048 so the double-buffered tiles fit v5e's 16 MiB scoped VMEM.
    rows = pl.cdiv(n, lanes)
    rows8 = max(8, pl.cdiv(rows, 8) * 8)
    tm = max(8, min((min(tm, 2048) // 8) * 8, rows8))
    nblocks = pl.cdiv(rows8, tm)
    rows_padded = nblocks * tm
    n_padded = rows_padded * lanes

    pf = pred.reshape(-1)
    tf = target.reshape(-1)
    pad = n_padded - n
    if pad:
        # Zero padding: target=0 -> background with diff=0, contributes nothing to
        # any accumulated sum; the true bg count is recovered below from n.
        pf = jnp.pad(pf, (0, pad))
        tf = jnp.pad(tf, (0, pad))
    p2 = pf.reshape(rows_padded, lanes)
    t2 = tf.reshape(rows_padded, lanes)

    itemsize = jnp.dtype(pred.dtype).itemsize
    cost = pl.CostEstimate(
        flops=6 * n_padded,
        transcendentals=0,
        bytes_accessed=2 * n_padded * itemsize + nblocks * 3 * 8 * 128 * 4,
    )

    parts = pl.pallas_call(
        _regl2_kernel,
        out_shape=jax.ShapeDtypeStruct((nblocks, 3, 8, 128), jnp.float32),
        grid_spec=pltpu.PrefetchScalarGridSpec(
            num_scalar_prefetch=0,
            grid=(nblocks,),
            in_specs=[
                pl.BlockSpec((tm, lanes), lambda i: (i, 0)),
                pl.BlockSpec((tm, lanes), lambda i: (i, 0)),
            ],
            out_specs=pl.BlockSpec((1, 3, 8, 128), lambda i: (i, 0, 0, 0)),
        ),
        compiler_params=pltpu.CompilerParams(
            dimension_semantics=("parallel",)),
        cost_estimate=cost,
    )(p2, t2)

    # Tiny final reduction + divides in XLA.
    fore_sq = jnp.sum(parts[:, 0])
    tot_sq = jnp.sum(parts[:, 1])
    fore_cnt = jnp.sum(parts[:, 2])
    back_sq = tot_sq - fore_sq
    back_cnt = jnp.float32(n) - fore_cnt
    return back_sq / back_cnt + fore_sq / fore_cnt


def _reference(pred, target):
    pred = pred.astype(jnp.float32)
    target = target.astype(jnp.float32)
    fg = (target > 0).astype(jnp.float32)
    bg = 1.0 - fg
    diff2 = (pred - target) ** 2
    fore = jnp.sum(diff2 * fg) / jnp.sum(fg)
    back = jnp.sum(diff2 * bg) / jnp.sum(bg)
    return back + fore


if __name__ == "__main__":
    key = jax.random.PRNGKey(0)
    kp, kt = jax.random.split(key)

    # batch=2, c=4, z=4, y=8, x=16 -> 4096 elems = 32 rows x 128 lanes
    shape = (2, 4, 4, 8, 16)
    pred = jax.random.normal(kp, shape, dtype=jnp.float32)
    target = jax.random.normal(kt, shape, dtype=jnp.float32)

    loss = reg_l2_loss(pred, target)
    jax.block_until_ready(loss)
    ref = _reference(pred, target)
    assert jnp.allclose(loss, ref, rtol=1e-5, atol=1e-5), (loss, ref)

    # Padding + bf16 path: odd element count (2*3*5*7*11 = 2310), in-kernel cast.
    shape2 = (2, 3, 5, 7, 11)
    kp2, kt2 = jax.random.split(kt)
    pred2 = jax.random.normal(kp2, shape2, dtype=jnp.bfloat16)
    target2 = jax.random.normal(kt2, shape2, dtype=jnp.bfloat16)
    loss2 = reg_l2_loss(pred2, target2)
    jax.block_until_ready(loss2)
    ref2 = _reference(pred2, target2)
    assert jnp.allclose(loss2, ref2, rtol=1e-4, atol=1e-4), (loss2, ref2)

    print("KERNEL_OK")
</pallas_src>

<mosaic_0001>
module attributes {stable_mosaic.version = 11 : i64} {
  func.func @_regl2_kernel(%arg0: i32, %arg1: memref<32x128xf32, #tpu.memory_space<vmem>>, %arg2: memref<32x128xf32, #tpu.memory_space<vmem>>, %arg3: memref<1x3x8x128xf32, #tpu.memory_space<vmem>>) attributes {dimension_semantics = [#tpu.dimension_semantics<parallel>], iteration_bounds = array<i64: 1>, scalar_prefetch = 0 : i64, scratch_operands = 0 : i64, tpu.core_type = #tpu.core_type<tc>, window_params = [{transform_indices = @transform_0, window_bounds = array<i64: 32, 128>}, {transform_indices = @transform_1, window_bounds = array<i64: 32, 128>}, {transform_indices = @transform_2, window_bounds = array<i64: 1, 3, 8, 128>}]} {
    %c0 = arith.constant 0 : index
    %c0_0 = arith.constant 0 : index
    %0 = vector.load %arg1[%c0, %c0_0] : memref<32x128xf32, #tpu.memory_space<vmem>>, vector<32x128xf32>
    %c0_1 = arith.constant 0 : index
    %c0_2 = arith.constant 0 : index
    %1 = vector.load %arg2[%c0_1, %c0_2] : memref<32x128xf32, #tpu.memory_space<vmem>>, vector<32x128xf32>
    %2 = arith.subf %0, %1 : vector<32x128xf32>
    %3 = arith.mulf %2, %2 : vector<32x128xf32>
    %cst = arith.constant 0.000000e+00 : f32
    %4 = vector.broadcast %cst : f32 to vector<32x128xf32>
    %5 = arith.cmpf ogt, %1, %4 : vector<32x128xf32>
    %6 = arith.extui %5 : vector<32x128xi1> to vector<32x128xi32>
    %7 = arith.sitofp %6 : vector<32x128xi32> to vector<32x128xf32>
    %8 = arith.mulf %3, %7 : vector<32x128xf32>
    %9 = vector.shape_cast %8 : vector<32x128xf32> to vector<4x8x128xf32>
    %cst_3 = arith.constant dense<0.000000e+00> : vector<8x128xf32>
    %10 = vector.multi_reduction <add>, %9, %cst_3 [0] : vector<4x8x128xf32> to vector<8x128xf32>
    %c0_4 = arith.constant 0 : index
    %c0_5 = arith.constant 0 : index
    %c0_6 = arith.constant 0 : index
    %c0_7 = arith.constant 0 : index
    %11 = vector.load %arg3[%c0_4, %c0_5, %c0_6, %c0_7] : memref<1x3x8x128xf32, #tpu.memory_space<vmem>>, vector<1x1x8x128xf32>
    %12 = vector.shape_cast %11 : vector<1x1x8x128xf32> to vector<8x128xf32>
    %13 = vector.shape_cast %10 : vector<8x128xf32> to vector<1x1x8x128xf32>
    tpu.vector_store %arg3[%c0_4, %c0_5, %c0_6, %c0_7], %13 {strides = array<i32>} : memref<1x3x8x128xf32, #tpu.memory_space<vmem>>, vector<1x1x8x128xf32>,
    %14 = vector.shape_cast %3 : vector<32x128xf32> to vector<4x8x128xf32>
    %cst_8 = arith.constant dense<0.000000e+00> : vector<8x128xf32>
    %15 = vector.multi_reduction <add>, %14, %cst_8 [0] : vector<4x8x128xf32> to vector<8x128xf32>
    %c0_9 = arith.constant 0 : index
    %c1 = arith.constant 1 : index
    %c0_10 = arith.constant 0 : index
    %c0_11 = arith.constant 0 : index
    %16 = vector.load %arg3[%c0_9, %c1, %c0_10, %c0_11] : memref<1x3x8x128xf32, #tpu.memory_space<vmem>>, vector<1x1x8x128xf32>
    %17 = vector.shape_cast %16 : vector<1x1x8x128xf32> to vector<8x128xf32>
    %18 = vector.shape_cast %15 : vector<8x128xf32> to vector<1x1x8x128xf32>
    tpu.vector_store %arg3[%c0_9, %c1, %c0_10, %c0_11], %18 {strides = array<i32>} : memref<1x3x8x128xf32, #tpu.memory_space<vmem>>, vector<1x1x8x128xf32>,
    %19 = vector.shape_cast %7 : vector<32x128xf32> to vector<4x8x128xf32>
    %cst_12 = arith.constant dense<0.000000e+00> : vector<8x128xf32>
    %20 = vector.multi_reduction <add>, %19, %cst_12 [0] : vector<4x8x128xf32> to vector<8x128xf32>
    %c0_13 = arith.constant 0 : index
    %c2 = arith.constant 2 : index
    %c0_14 = arith.constant 0 : index
    %c0_15 = arith.constant 0 : index
    %21 = vector.load %arg3[%c0_13, %c2, %c0_14, %c0_15] : memref<1x3x8x128xf32, #tpu.memory_space<vmem>>, vector<1x1x8x128xf32>
    %22 = vector.shape_cast %21 : vector<1x1x8x128xf32> to vector<8x128xf32>
    %23 = vector.shape_cast %20 : vector<8x128xf32> to vector<1x1x8x128xf32>
    tpu.vector_store %arg3[%c0_13, %c2, %c0_14, %c0_15], %23 {strides = array<i32>} : memref<1x3x8x128xf32, #tpu.memory_space<vmem>>, vector<1x1x8x128xf32>,
    return
  }
  func.func @transform_0(%arg0: i32) -> (i32, i32) {
    %c0_i32 = arith.constant 0 : i32
    %c0_i32_0 = arith.constant 0 : i32
    return %arg0, %c0_i32 : i32, i32
  }
  func.func @transform_1(%arg0: i32) -> (i32, i32) {
    %c0_i32 = arith.constant 0 : i32
    %c0_i32_0 = arith.constant 0 : i32
    return %arg0, %c0_i32 : i32, i32
  }
  func.func @transform_2(%arg0: i32) -> (i32, i32, i32, i32) {
    %c0_i32 = arith.constant 0 : i32
    %c0_i32_0 = arith.constant 0 : i32
    %c0_i32_1 = arith.constant 0 : i32
    %c0_i32_2 = arith.constant 0 : i32
    return %arg0, %c0_i32, %c0_i32_0, %c0_i32_1 : i32, i32, i32, i32
  }
}

</mosaic_0001>

<bundles_post_ra>
// kernel: tpu_custom_call.1
= control target key start
LH: loop header
LB: loop body
LE: loop exit
PB: predicated region body
PF: predicated region fallthrough
CT: control target
= control target key end

     0   :  { %7 = vsyncpa [#allocation3], 0  ;;  %s252_s0 = inlined_call_operand.hbm [shape: f32[32,128], index: 0, kind: input, shape index: {}]   ;;  %s253_s1 = inlined_call_operand.hbm [shape: f32[32,128], index: 1, kind: input, shape index: {}]   ;;  %s254_s2 = inlined_call_operand.hbm [shape: f32[1,3,8,128], index: 2, kind: output, shape index: {}]  }
   0x1   :  { %8 = vsyncpa [#allocation6], 0 }
   0x2   :  { %9 = vsyncpa [#allocation4], 0  ;;  %s186_s9 = smov [#allocation2]   ;;  %s114_s13 = scalar_lea.hbm %s252_s0, 512 }
   0x3   :  { %s15_s10 = sshll.u32 %s186_s9, 4  ;;  %p115_p0 = scmp.ne.s32.totalorder %s252_s0, %s114_s13  ;;  %s16_s10 = int_to_ptr.vmem [resolvable:$true] %s15_s10 }
   0x4   :  { %p118_p1 = scmp.lt.u32.totalorder %s114_s13, %s252_s0 }
   0x6   :  { %p120_p2 = pnand %p118_p1, %p115_p0 }
   0x8   :  { %123 = shalt.err (!%p120_p2)
}
   0x9   :  { %s124_s18 = scalar_lea.vmem %s16_s10, 512  ;;  %p129_p4 = scmp.lt.s32.totalorder %s16_s10, %s16_s10 }
   0xa   :  { %p125_p3 = scmp.ne.s32.totalorder %s16_s10, %s124_s18  ;;  %p130_p5 = scmp.lt.s32.totalorder %s124_s18, %s124_s18 }
   0xc   :  { %p131_p6 = por %p130_p5, %p129_p4 }
   0xe   :  { %p132_p7 = pnand %p131_p6, %p125_p3 }
  0x10   :  { %135 = shalt.err (!%p132_p7)
}
  0x11   :  { %s187_s19 = smov 128   ;;  %s188_s20 = smov 8  }
  0x12   :  { %21 = dma.hbm_to_vmem [thread:$0]  %s252_s0, 512, %s16_s10, [#allocation3], %s187_s19, %s187_s19, %s188_s20  }
  0x13   :  { %s189_s23 = smov [#allocation5]   ;;  %s136_s27 = scalar_lea.hbm %s253_s1, 512 }
  0x14   :  { %s27_s24 = sshll.u32 %s189_s23, 4  ;;  %p137_p8 = scmp.ne.s32.totalorder %s253_s1, %s136_s27  ;;  %s28_s24 = int_to_ptr.vmem [resolvable:$true] %s27_s24 }
  0x15   :  { %p140_p9 = scmp.lt.u32.totalorder %s136_s27, %s253_s1 }
  0x17   :  { %p142_p10 = pnand %p140_p9, %p137_p8 }
  0x19   :  { %145 = shalt.err (!%p142_p10)
}
  0x1a   :  { %s146_s4 = scalar_lea.vmem %s28_s24, 512  ;;  %p151_p12 = scmp.lt.s32.totalorder %s28_s24, %s28_s24 }
  0x1b   :  { %p147_p11 = scmp.ne.s32.totalorder %s28_s24, %s146_s4  ;;  %p152_p13 = scmp.lt.s32.totalorder %s146_s4, %s146_s4 }
  0x1d   :  { %p153_p0 = por %p152_p13, %p151_p12 }
  0x1f   :  { %p154_p1 = pnand %p153_p0, %p147_p11 }
  0x21   :  { %157 = shalt.err (!%p154_p1)
}
  0x22   :  { %33 = dma.hbm_to_vmem [thread:$0]  %s253_s1, 512, %s28_s24, [#allocation6], %s187_s19, %s187_s19, %s188_s20  }
  0x23   :  { %180 = dma.done.wait [#allocation3], 512  }
  0x24   :  { %181 = vsyncadd [#allocation3], 4294966784 }
  0x25   :  { %182 = dma.done.wait [#allocation6], 512  }
  0x26   :  { %183 = vsyncadd [#allocation6], 4294966784  ;;  %v40_v0 = vld [vmem:[#allocation2] sm:$0xff]  ;;  %v41_v1 = vld [vmem:[#allocation2 + $0x8] sm:$0xff]  ;;  %v190_v14 = vmov 0.0   ;;  %s191_s1 = smov [#allocation7]  }
  0x27   :  { %v42_v2 = vld [vmem:[#allocation2 + $0x10] sm:$0xff]  ;;  %v43_v3 = vld [vmem:[#allocation2 + $0x18] sm:$0xff]  ;;  %v44_v4 = vld [vmem:[#allocation5] sm:$0xff]  ;;  %s91_s6 = sshll.u32 %s191_s1, 4  ;;  %s92_s6 = int_to_ptr.vmem [resolvable:$true] %s91_s6 }
  0x28   :  { %v45_v5 = vld [vmem:[#allocation5 + $0x8] sm:$0xff]  ;;  %v46_v6 = vld [vmem:[#allocation5 + $0x10] sm:$0xff]  ;;  %v47_v7 = vld [vmem:[#allocation5 + $0x18] sm:$0xff]  ;;  %v48_v8 = vsub.f32 %v40_v0, %v44_v4  ;;  %vm56_vm0 = vcmp.gt.f32.partialorder %v44_v4, 0.0  ;;  %s158_s7 = scalar_lea.vmem %s92_s6, 384  ;;  %p163_p3 = scmp.lt.s32.totalorder %s92_s6, %s92_s6 }
  0x29   :  { %v49_v9 = vsub.f32 %v41_v1, %v45_v5  ;;  %vm57_vm1 = vcmp.gt.f32.partialorder %v45_v5, 0.0  ;;  %v50_v10 = vsub.f32 %v42_v2, %v46_v6  ;;  %v51_v11 = vsub.f32 %v43_v3, %v47_v7  ;;  %p159_p2 = scmp.ne.s32.totalorder %s92_s6, %s158_s7  ;;  %p164_p4 = scmp.lt.s32.totalorder %s158_s7, %s158_s7 }
  0x2a   :  { %vm58_vm2 = vcmp.gt.f32.partialorder %v46_v6, 0.0  ;;  %vm59_vm3 = vcmp.gt.f32.partialorder %v47_v7, 0.0  ;;  %v52_v12 = vmul.f32 %v48_v8, %v48_v8  ;;  %v104_v15 = vsel %vm56_vm0, 1.0, %v190_v14 }
  0x2b   :  { %v53_v13 = vmul.f32 %v49_v9, %v49_v9  ;;  %v105_v16 = vsel %vm57_vm1, 1.0, %v190_v14  ;;  %v54_v17 = vmul.f32 %v50_v10, %v50_v10  ;;  %v55_v18 = vmul.f32 %v51_v11, %v51_v11  ;;  %p165_p5 = por %p164_p4, %p163_p3 }
  0x2c   :  { %v106_v19 = vsel %vm58_vm2, 1.0, %v190_v14  ;;  %v107_v20 = vsel %vm59_vm3, 1.0, %v190_v14  ;;  %v68_v21 = vmul.f32 %v104_v15, %v52_v12  ;;  %v81_v24 = vadd.f32 %v105_v16, %v104_v15 }
  0x2d   :  { %v69_v22 = vmul.f32 %v105_v16, %v53_v13  ;;  %v76_v23 = vadd.f32 %v53_v13, %v52_v12  ;;  %v70_v25 = vmul.f32 %v106_v19, %v54_v17  ;;  %v71_v26 = vmul.f32 %v107_v20, %v55_v18  ;;  %p166_p6 = pnand %p165_p5, %p159_p2 }
  0x2e   :  { %v82_v29 = vadd.f32 %v106_v19, %v81_v24 }
  0x2f   :  { %v72_v27 = vadd.f32 %v69_v22, %v68_v21  ;;  %v77_v28 = vadd.f32 %v76_v23, %v54_v17 }
  0x30   :  { %v83_v32 = vadd.f32 %v107_v20, %v82_v29 }
  0x31   :  { %v73_v30 = vadd.f32 %v72_v27, %v70_v25  ;;  %v78_v31 = vadd.f32 %v77_v28, %v55_v18 }
  0x32   :  { %85 = vst [vmem:[#allocation7 + $0x10] sm:$0xff] %v83_v32 }
  0x33   :  { %v74_v33 = vadd.f32 %v73_v30, %v71_v26  ;;  %80 = vst [vmem:[#allocation7 + $0x8] sm:$0xff] %v78_v31 }
  0x35   :  { %75 = vst [vmem:[#allocation7] sm:$0xff] %v74_v33 }
  0x36   :  { %169 = shalt.err (!%p166_p6)
}
  0x37   :  { %s170_s10 = scalar_lea.hbm %s254_s2, 384 }
  0x38   :  { %p171_p7 = scmp.ne.s32.totalorder %s254_s2, %s170_s10  ;;  %p174_p8 = scmp.lt.u32.totalorder %s170_s10, %s254_s2 }
  0x3a   :  { %p176_p9 = pnand %p174_p8, %p171_p7 }
  0x3c   :  { %179 = shalt.err (!%p176_p9)
}
  0x3d   :  { %97 = dma.vmem_to_hbm [thread:$0]  %s92_s6, 384, %s254_s2, [#allocation4], %s187_s19, %s187_s19, %s188_s20  }
  0x3e   :  { %184 = dma.done.wait [#allocation4], 384  }
  0x3f   :  { %185 = vsyncadd [#allocation4], 4294966912 }
  0x40   :  { %101 = vsyncpa [#allocation3], 1 }
  0x41   :  { %102 = vsyncpa [#allocation6], 1 }
  0x42   :  { %103 = vsyncpa [#allocation4], 1 }

</bundles_post_ra>
